<compile_context>
chip_gen: v6e
topology: v6e:2x2x1
jax: 0.10.0
libtpu: 0.0.40
codegen_flags: <defaults>
</compile_context>

<pallas_src>
import numpy as np
import jax
import jax.numpy as jnp
from jax.experimental import pallas as pl
from jax.experimental.pallas import tpu as pltpu

IN_DIM = 13
H_DIM = 40
LAYER_NUM = 5
OUT_DIM = 1
BN_EPS = 1e-5
N_STAGES = LAYER_NUM + 1        # 6 (Linear -> BN -> ReLU) stages


def _mlp_kernel(x_ref, w_ref, vecs_ref, b_out_ref, o_ref):
    """Fused forward.

    x_ref     [N, 13]        VMEM  activations (HBM traffic stays 13-wide)
    w_ref     [6, 40, 40]    VMEM  pre-BN weights; w[0] rows 13..39 are zero pad
    vecs_ref  [13, 40]       VMEM  rows 0..5 gamma, 6..11 beta, 12 = output row
    b_out_ref [1, 1]         SMEM  output bias scalar
    o_ref     [N, 1]         VMEM  output
    """
    n = x_ref.shape[0]
    inv_n = 1.0 / n                                    # static Python float

    def bn_relu(h, layer):
        # rank-2 keepdims slices straight off the ref (no rank-1 broadcasts)
        gamma = vecs_ref[layer:layer + 1, :]                          # [1, 40]
        beta = vecs_ref[N_STAGES + layer:N_STAGES + layer + 1, :]     # [1, 40]
        # shifted one-pass stats: per-feature pivot removes the catastrophic
        # E[h^2]-mean^2 cancellation on real data; s1/s2 stay independent so
        # the two sublane reduces can overlap on the XLUs.
        pivot = h[0:1, :]                                             # [1, 40]
        d = h - pivot
        s1 = jnp.sum(d, axis=0, keepdims=True)
        s2 = jnp.sum(d * d, axis=0, keepdims=True)
        dmean = s1 * inv_n
        mean = pivot + dmean
        var = jnp.maximum(s2 * inv_n - dmean * dmean, 0.0)
        # fold BN affine into a single FMA; rsqrt rides the EUP slot
        scale = gamma * jax.lax.rsqrt(var + BN_EPS)                   # [1, 40]
        shift = beta - mean * scale                                   # [1, 40]
        return jnp.maximum(h * scale + shift, 0.0)

    # input layer: use the leading 13 rows of the packed weight (static ref
    # slice, zero runtime cost) -- x is never padded on host or in HBM.
    # Pre-BN biases omitted: cancelled exactly by the batch-mean subtraction.
    h = jnp.dot(x_ref[...], w_ref[0, :IN_DIM, :],
                preferred_element_type=jnp.float32)                   # [N, 40]
    h = bn_relu(h, 0)

    # hidden layers (static unroll; LAYER_NUM is a Python constant)
    for i in range(LAYER_NUM):
        h = jnp.dot(h, w_ref[i + 1], preferred_element_type=jnp.float32)
        h = bn_relu(h, i + 1)

    # output layer on the VPU/XLU: [N,40] * [1,40] row, lane reduce -> [N,1];
    # keeps the tiny K=40, N=1 matmul off the MXU.  Bias is an SMEM scalar.
    w_out_row = vecs_ref[2 * N_STAGES:2 * N_STAGES + 1, :]            # [1, 40]
    out = jnp.sum(h * w_out_row, axis=-1, keepdims=True) + b_out_ref[0, 0]
    o_ref[...] = out                                                  # [N, 1]


def mlp_forward(x, params):
    (w_in, _b_in, wh, _bh, gamma, beta, w_out, b_out) = params
    n = x.shape[0]

    # ---- operand packing: 4 kernel inputs (was 6) ---------------------------
    w_in_pad = jnp.pad(w_in, ((0, H_DIM - IN_DIM), (0, 0)))           # [40, 40]
    w_all = jnp.concatenate([w_in_pad[None], wh], axis=0)             # [6, 40, 40]
    vecs = jnp.concatenate(
        [gamma, beta, jnp.reshape(w_out, (1, H_DIM))], axis=0)        # [13, 40]
    b_out_s = jnp.reshape(b_out, (1, 1)).astype(jnp.float32)          # SMEM scalar

    flops = (2 * n * (IN_DIM * H_DIM + LAYER_NUM * H_DIM * H_DIM + H_DIM)
             + 10 * n * H_DIM * N_STAGES)          # BN stats + FMA + ReLU
    bytes_accessed = 4 * (x.size + w_all.size + vecs.size + 1 + n * OUT_DIM)
    cost = pl.CostEstimate(flops=flops,
                           transcendentals=N_STAGES * H_DIM,
                           bytes_accessed=bytes_accessed)

    vmem = pl.BlockSpec(memory_space=pltpu.MemorySpace.VMEM)
    smem = pl.BlockSpec(memory_space=pltpu.MemorySpace.SMEM)

    # No grid: whole working set (< 64 KiB) fits a single VMEM block per
    # operand on every chip.  For large N: transposed [feature, batch] layout
    # + batch grid axis (lane-dense stores, pipelining, 2nd v7x core).
    return pl.pallas_call(
        _mlp_kernel,
        out_shape=jax.ShapeDtypeStruct((n, OUT_DIM), jnp.float32),
        in_specs=[vmem, vmem, vmem, smem],
        out_specs=vmem,
        cost_estimate=cost,
    )(x, w_all, vecs, b_out_s)


def _xavier_uniform(key, fan_in, fan_out, gain):
    # torch.nn.init.xavier_uniform: bound = gain * sqrt(6 / (fan_in + fan_out))
    bound = gain * np.sqrt(6.0 / (fan_in + fan_out))
    # stored pre-transposed: [fan_in, fan_out]
    return jax.random.uniform(key, (fan_in, fan_out), jnp.float32,
                              minval=-bound, maxval=bound)


def init_params(key):
    gain = np.sqrt(2.0)
    keys = jax.random.split(key, 2 + LAYER_NUM)

    w_in = _xavier_uniform(keys[0], IN_DIM, H_DIM, gain)              # [13, 40]
    b_in = jnp.full((1, H_DIM), 0.01, jnp.float32)                    # [1, 40]

    wh = jnp.stack([_xavier_uniform(keys[1 + i], H_DIM, H_DIM, gain)
                    for i in range(LAYER_NUM)], axis=0)               # [5, 40, 40]
    bh = jnp.full((LAYER_NUM, H_DIM), 0.01, jnp.float32)              # [5, 40]

    # BatchNorm1d fresh init: weight (gamma) = 1, bias (beta) = 0, 6 BN layers
    gamma = jnp.ones((N_STAGES, H_DIM), jnp.float32)                  # [6, 40]
    beta = jnp.zeros((N_STAGES, H_DIM), jnp.float32)                  # [6, 40]

    w_out = _xavier_uniform(keys[1 + LAYER_NUM], H_DIM, OUT_DIM, gain)  # [40, 1]
    b_out = jnp.full((1, OUT_DIM), 0.01, jnp.float32)                 # [1, 1]

    return (w_in, b_in, wh, bh, gamma, beta, w_out, b_out)


def reference_forward(x, params):
    """Pure-JAX reference with the original PyTorch semantics (biases included)."""
    (w_in, b_in, wh, bh, gamma, beta, w_out, b_out) = params

    def bn_relu(h, g, b):
        mean = jnp.mean(h, axis=0, keepdims=True)
        var = jnp.mean((h - mean) ** 2, axis=0, keepdims=True)
        return jnp.maximum((h - mean) / jnp.sqrt(var + BN_EPS) * g + b, 0.0)

    h = x @ w_in + b_in
    h = bn_relu(h, gamma[0:1], beta[0:1])
    for i in range(LAYER_NUM):
        h = h @ wh[i] + bh[i:i + 1]
        h = bn_relu(h, gamma[i + 1:i + 2], beta[i + 1:i + 2])
    return h @ w_out + b_out


if __name__ == "__main__":
    key = jax.random.PRNGKey(0)
    k_x, k_p = jax.random.split(key)

    N = 16  # batch size (> 1 required for meaningful training-mode BatchNorm)
    x = jax.random.normal(k_x, (N, IN_DIM), jnp.float32)
    params = init_params(k_p)

    out = mlp_forward(x, params)
    out = jax.block_until_ready(out)

    ref = reference_forward(x, params)
    np.testing.assert_allclose(np.asarray(out), np.asarray(ref),
                               rtol=1e-4, atol=1e-4)
    assert out.shape == (N, OUT_DIM)
    print("KERNEL_OK")
</pallas_src>

<mosaic_0001>
module attributes {stable_mosaic.version = 11 : i64} {
  func.func @_mlp_kernel(%arg0: memref<16x13xf32, #tpu.memory_space<vmem>>, %arg1: memref<6x40x40xf32, #tpu.memory_space<vmem>>, %arg2: memref<13x40xf32, #tpu.memory_space<vmem>>, %arg3: memref<1x1xf32, #tpu.memory_space<smem>>, %arg4: memref<16x1xf32, #tpu.memory_space<vmem>>) attributes {dimension_semantics = [], scalar_prefetch = 0 : i64, scratch_operands = 0 : i64, tpu.core_type = #tpu.core_type<tc>} {
    %c0 = arith.constant 0 : index
    %c0_0 = arith.constant 0 : index
    %0 = vector.load %arg0[%c0, %c0_0] : memref<16x13xf32, #tpu.memory_space<vmem>>, vector<16x13xf32>
    %c0_1 = arith.constant 0 : index
    %c0_2 = arith.constant 0 : index
    %c0_3 = arith.constant 0 : index
    %1 = vector.load %arg1[%c0_1, %c0_2, %c0_3] : memref<6x40x40xf32, #tpu.memory_space<vmem>>, vector<1x13x40xf32>
    %2 = vector.shape_cast %1 : vector<1x13x40xf32> to vector<13x40xf32>
    %cst = arith.constant dense<0.000000e+00> : vector<16x40xf32>
    %3 = tpu.matmul %0, %2, %cst {dimension_numbers = #tpu.dot_dimension_numbers<[1], [0], [0], [1], [0, 0, 1, 1], [], []>} : vector<16x13xf32>, vector<13x40xf32>, vector<16x40xf32> -> vector<16x40xf32>
    %c0_4 = arith.constant 0 : index
    %c0_5 = arith.constant 0 : index
    %4 = vector.load %arg2[%c0_4, %c0_5] : memref<13x40xf32, #tpu.memory_space<vmem>>, vector<1x40xf32>
    %c6 = arith.constant 6 : index
    %c0_6 = arith.constant 0 : index
    %5 = vector.load %arg2[%c6, %c0_6] : memref<13x40xf32, #tpu.memory_space<vmem>>, vector<1x40xf32>
    %6 = vector.extract_strided_slice %3 {offsets = [0, 0], sizes = [1, 40], strides = [1, 1]} : vector<16x40xf32> to vector<1x40xf32>
    %7 = vector.broadcast %6 : vector<1x40xf32> to vector<16x40xf32>
    %8 = arith.subf %3, %7 : vector<16x40xf32>
    %cst_7 = arith.constant dense<0.000000e+00> : vector<40xf32>
    %9 = vector.multi_reduction <add>, %8, %cst_7 [0] : vector<16x40xf32> to vector<40xf32>
    %10 = vector.shape_cast %9 : vector<40xf32> to vector<1x40xf32>
    %11 = arith.mulf %8, %8 : vector<16x40xf32>
    %cst_8 = arith.constant dense<0.000000e+00> : vector<40xf32>
    %12 = vector.multi_reduction <add>, %11, %cst_8 [0] : vector<16x40xf32> to vector<40xf32>
    %13 = vector.shape_cast %12 : vector<40xf32> to vector<1x40xf32>
    %cst_9 = arith.constant 6.250000e-02 : f32
    %14 = vector.broadcast %cst_9 : f32 to vector<1x40xf32>
    %15 = arith.mulf %10, %14 : vector<1x40xf32>
    %16 = arith.addf %6, %15 : vector<1x40xf32>
    %cst_10 = arith.constant 6.250000e-02 : f32
    %17 = vector.broadcast %cst_10 : f32 to vector<1x40xf32>
    %18 = arith.mulf %13, %17 : vector<1x40xf32>
    %19 = arith.mulf %15, %15 : vector<1x40xf32>
    %20 = arith.subf %18, %19 : vector<1x40xf32>
    %cst_11 = arith.constant 0.000000e+00 : f32
    %21 = vector.broadcast %cst_11 : f32 to vector<1x40xf32>
    %22 = arith.maximumf %20, %21 : vector<1x40xf32>
    %cst_12 = arith.constant 9.99999974E-6 : f32
    %23 = vector.broadcast %cst_12 : f32 to vector<1x40xf32>
    %24 = arith.addf %22, %23 : vector<1x40xf32>
    %25 = math.rsqrt %24 : vector<1x40xf32>
    %26 = arith.mulf %4, %25 : vector<1x40xf32>
    %27 = arith.mulf %16, %26 : vector<1x40xf32>
    %28 = arith.subf %5, %27 : vector<1x40xf32>
    %29 = vector.broadcast %26 : vector<1x40xf32> to vector<16x40xf32>
    %30 = arith.mulf %3, %29 : vector<16x40xf32>
    %31 = vector.broadcast %28 : vector<1x40xf32> to vector<16x40xf32>
    %32 = arith.addf %30, %31 : vector<16x40xf32>
    %cst_13 = arith.constant 0.000000e+00 : f32
    %33 = vector.broadcast %cst_13 : f32 to vector<16x40xf32>
    %34 = arith.maximumf %32, %33 : vector<16x40xf32>
    %c1 = arith.constant 1 : index
    %c0_14 = arith.constant 0 : index
    %c0_15 = arith.constant 0 : index
    %35 = vector.load %arg1[%c1, %c0_14, %c0_15] : memref<6x40x40xf32, #tpu.memory_space<vmem>>, vector<1x40x40xf32>
    %36 = vector.shape_cast %35 : vector<1x40x40xf32> to vector<40x40xf32>
    %cst_16 = arith.constant dense<0.000000e+00> : vector<16x40xf32>
    %37 = tpu.matmul %34, %36, %cst_16 {dimension_numbers = #tpu.dot_dimension_numbers<[1], [0], [0], [1], [0, 0, 1, 1], [], []>} : vector<16x40xf32>, vector<40x40xf32>, vector<16x40xf32> -> vector<16x40xf32>
    %c1_17 = arith.constant 1 : index
    %c0_18 = arith.constant 0 : index
    %38 = vector.load %arg2[%c1_17, %c0_18] : memref<13x40xf32, #tpu.memory_space<vmem>>, vector<1x40xf32>
    %c7 = arith.constant 7 : index
    %c0_19 = arith.constant 0 : index
    %39 = vector.load %arg2[%c7, %c0_19] : memref<13x40xf32, #tpu.memory_space<vmem>>, vector<1x40xf32>
    %40 = vector.extract_strided_slice %37 {offsets = [0, 0], sizes = [1, 40], strides = [1, 1]} : vector<16x40xf32> to vector<1x40xf32>
    %41 = vector.broadcast %40 : vector<1x40xf32> to vector<16x40xf32>
    %42 = arith.subf %37, %41 : vector<16x40xf32>
    %cst_20 = arith.constant dense<0.000000e+00> : vector<40xf32>
    %43 = vector.multi_reduction <add>, %42, %cst_20 [0] : vector<16x40xf32> to vector<40xf32>
    %44 = vector.shape_cast %43 : vector<40xf32> to vector<1x40xf32>
    %45 = arith.mulf %42, %42 : vector<16x40xf32>
    %cst_21 = arith.constant dense<0.000000e+00> : vector<40xf32>
    %46 = vector.multi_reduction <add>, %45, %cst_21 [0] : vector<16x40xf32> to vector<40xf32>
    %47 = vector.shape_cast %46 : vector<40xf32> to vector<1x40xf32>
    %cst_22 = arith.constant 6.250000e-02 : f32
    %48 = vector.broadcast %cst_22 : f32 to vector<1x40xf32>
    %49 = arith.mulf %44, %48 : vector<1x40xf32>
    %50 = arith.addf %40, %49 : vector<1x40xf32>
    %cst_23 = arith.constant 6.250000e-02 : f32
    %51 = vector.broadcast %cst_23 : f32 to vector<1x40xf32>
    %52 = arith.mulf %47, %51 : vector<1x40xf32>
    %53 = arith.mulf %49, %49 : vector<1x40xf32>
    %54 = arith.subf %52, %53 : vector<1x40xf32>
    %cst_24 = arith.constant 0.000000e+00 : f32
    %55 = vector.broadcast %cst_24 : f32 to vector<1x40xf32>
    %56 = arith.maximumf %54, %55 : vector<1x40xf32>
    %cst_25 = arith.constant 9.99999974E-6 : f32
    %57 = vector.broadcast %cst_25 : f32 to vector<1x40xf32>
    %58 = arith.addf %56, %57 : vector<1x40xf32>
    %59 = math.rsqrt %58 : vector<1x40xf32>
    %60 = arith.mulf %38, %59 : vector<1x40xf32>
    %61 = arith.mulf %50, %60 : vector<1x40xf32>
    %62 = arith.subf %39, %61 : vector<1x40xf32>
    %63 = vector.broadcast %60 : vector<1x40xf32> to vector<16x40xf32>
    %64 = arith.mulf %37, %63 : vector<16x40xf32>
    %65 = vector.broadcast %62 : vector<1x40xf32> to vector<16x40xf32>
    %66 = arith.addf %64, %65 : vector<16x40xf32>
    %cst_26 = arith.constant 0.000000e+00 : f32
    %67 = vector.broadcast %cst_26 : f32 to vector<16x40xf32>
    %68 = arith.maximumf %66, %67 : vector<16x40xf32>
    %c2 = arith.constant 2 : index
    %c0_27 = arith.constant 0 : index
    %c0_28 = arith.constant 0 : index
    %69 = vector.load %arg1[%c2, %c0_27, %c0_28] : memref<6x40x40xf32, #tpu.memory_space<vmem>>, vector<1x40x40xf32>
    %70 = vector.shape_cast %69 : vector<1x40x40xf32> to vector<40x40xf32>
    %cst_29 = arith.constant dense<0.000000e+00> : vector<16x40xf32>
    %71 = tpu.matmul %68, %70, %cst_29 {dimension_numbers = #tpu.dot_dimension_numbers<[1], [0], [0], [1], [0, 0, 1, 1], [], []>} : vector<16x40xf32>, vector<40x40xf32>, vector<16x40xf32> -> vector<16x40xf32>
    %c2_30 = arith.constant 2 : index
    %c0_31 = arith.constant 0 : index
    %72 = vector.load %arg2[%c2_30, %c0_31] : memref<13x40xf32, #tpu.memory_space<vmem>>, vector<1x40xf32>
    %c8 = arith.constant 8 : index
    %c0_32 = arith.constant 0 : index
    %73 = vector.load %arg2[%c8, %c0_32] : memref<13x40xf32, #tpu.memory_space<vmem>>, vector<1x40xf32>
    %74 = vector.extract_strided_slice %71 {offsets = [0, 0], sizes = [1, 40], strides = [1, 1]} : vector<16x40xf32> to vector<1x40xf32>
    %75 = vector.broadcast %74 : vector<1x40xf32> to vector<16x40xf32>
    %76 = arith.subf %71, %75 : vector<16x40xf32>
    %cst_33 = arith.constant dense<0.000000e+00> : vector<40xf32>
    %77 = vector.multi_reduction <add>, %76, %cst_33 [0] : vector<16x40xf32> to vector<40xf32>
    %78 = vector.shape_cast %77 : vector<40xf32> to vector<1x40xf32>
    %79 = arith.mulf %76, %76 : vector<16x40xf32>
    %cst_34 = arith.constant dense<0.000000e+00> : vector<40xf32>
    %80 = vector.multi_reduction <add>, %79, %cst_34 [0] : vector<16x40xf32> to vector<40xf32>
    %81 = vector.shape_cast %80 : vector<40xf32> to vector<1x40xf32>
    %cst_35 = arith.constant 6.250000e-02 : f32
    %82 = vector.broadcast %cst_35 : f32 to vector<1x40xf32>
    %83 = arith.mulf %78, %82 : vector<1x40xf32>
    %84 = arith.addf %74, %83 : vector<1x40xf32>
    %cst_36 = arith.constant 6.250000e-02 : f32
    %85 = vector.broadcast %cst_36 : f32 to vector<1x40xf32>
    %86 = arith.mulf %81, %85 : vector<1x40xf32>
    %87 = arith.mulf %83, %83 : vector<1x40xf32>
    %88 = arith.subf %86, %87 : vector<1x40xf32>
    %cst_37 = arith.constant 0.000000e+00 : f32
    %89 = vector.broadcast %cst_37 : f32 to vector<1x40xf32>
    %90 = arith.maximumf %88, %89 : vector<1x40xf32>
    %cst_38 = arith.constant 9.99999974E-6 : f32
    %91 = vector.broadcast %cst_38 : f32 to vector<1x40xf32>
    %92 = arith.addf %90, %91 : vector<1x40xf32>
    %93 = math.rsqrt %92 : vector<1x40xf32>
    %94 = arith.mulf %72, %93 : vector<1x40xf32>
    %95 = arith.mulf %84, %94 : vector<1x40xf32>
    %96 = arith.subf %73, %95 : vector<1x40xf32>
    %97 = vector.broadcast %94 : vector<1x40xf32> to vector<16x40xf32>
    %98 = arith.mulf %71, %97 : vector<16x40xf32>
    %99 = vector.broadcast %96 : vector<1x40xf32> to vector<16x40xf32>
    %100 = arith.addf %98, %99 : vector<16x40xf32>
    %cst_39 = arith.constant 0.000000e+00 : f32
    %101 = vector.broadcast %cst_39 : f32 to vector<16x40xf32>
    %102 = arith.maximumf %100, %101 : vector<16x40xf32>
    %c3 = arith.constant 3 : index
    %c0_40 = arith.constant 0 : index
    %c0_41 = arith.constant 0 : index
    %103 = vector.load %arg1[%c3, %c0_40, %c0_41] : memref<6x40x40xf32, #tpu.memory_space<vmem>>, vector<1x40x40xf32>
    %104 = vector.shape_cast %103 : vector<1x40x40xf32> to vector<40x40xf32>
    %cst_42 = arith.constant dense<0.000000e+00> : vector<16x40xf32>
    %105 = tpu.matmul %102, %104, %cst_42 {dimension_numbers = #tpu.dot_dimension_numbers<[1], [0], [0], [1], [0, 0, 1, 1], [], []>} : vector<16x40xf32>, vector<40x40xf32>, vector<16x40xf32> -> vector<16x40xf32>
    %c3_43 = arith.constant 3 : index
    %c0_44 = arith.constant 0 : index
    %106 = vector.load %arg2[%c3_43, %c0_44] : memref<13x40xf32, #tpu.memory_space<vmem>>, vector<1x40xf32>
    %c9 = arith.constant 9 : index
    %c0_45 = arith.constant 0 : index
    %107 = vector.load %arg2[%c9, %c0_45] : memref<13x40xf32, #tpu.memory_space<vmem>>, vector<1x40xf32>
    %108 = vector.extract_strided_slice %105 {offsets = [0, 0], sizes = [1, 40], strides = [1, 1]} : vector<16x40xf32> to vector<1x40xf32>
    %109 = vector.broadcast %108 : vector<1x40xf32> to vector<16x40xf32>
    %110 = arith.subf %105, %109 : vector<16x40xf32>
    %cst_46 = arith.constant dense<0.000000e+00> : vector<40xf32>
    %111 = vector.multi_reduction <add>, %110, %cst_46 [0] : vector<16x40xf32> to vector<40xf32>
    %112 = vector.shape_cast %111 : vector<40xf32> to vector<1x40xf32>
    %113 = arith.mulf %110, %110 : vector<16x40xf32>
    %cst_47 = arith.constant dense<0.000000e+00> : vector<40xf32>
    %114 = vector.multi_reduction <add>, %113, %cst_47 [0] : vector<16x40xf32> to vector<40xf32>
    %115 = vector.shape_cast %114 : vector<40xf32> to vector<1x40xf32>
    %cst_48 = arith.constant 6.250000e-02 : f32
    %116 = vector.broadcast %cst_48 : f32 to vector<1x40xf32>
    %117 = arith.mulf %112, %116 : vector<1x40xf32>
    %118 = arith.addf %108, %117 : vector<1x40xf32>
    %cst_49 = arith.constant 6.250000e-02 : f32
    %119 = vector.broadcast %cst_49 : f32 to vector<1x40xf32>
    %120 = arith.mulf %115, %119 : vector<1x40xf32>
    %121 = arith.mulf %117, %117 : vector<1x40xf32>
    %122 = arith.subf %120, %121 : vector<1x40xf32>
    %cst_50 = arith.constant 0.000000e+00 : f32
    %123 = vector.broadcast %cst_50 : f32 to vector<1x40xf32>
    %124 = arith.maximumf %122, %123 : vector<1x40xf32>
    %cst_51 = arith.constant 9.99999974E-6 : f32
    %125 = vector.broadcast %cst_51 : f32 to vector<1x40xf32>
    %126 = arith.addf %124, %125 : vector<1x40xf32>
    %127 = math.rsqrt %126 : vector<1x40xf32>
    %128 = arith.mulf %106, %127 : vector<1x40xf32>
    %129 = arith.mulf %118, %128 : vector<1x40xf32>
    %130 = arith.subf %107, %129 : vector<1x40xf32>
    %131 = vector.broadcast %128 : vector<1x40xf32> to vector<16x40xf32>
    %132 = arith.mulf %105, %131 : vector<16x40xf32>
    %133 = vector.broadcast %130 : vector<1x40xf32> to vector<16x40xf32>
    %134 = arith.addf %132, %133 : vector<16x40xf32>
    %cst_52 = arith.constant 0.000000e+00 : f32
    %135 = vector.broadcast %cst_52 : f32 to vector<16x40xf32>
    %136 = arith.maximumf %134, %135 : vector<16x40xf32>
    %c4 = arith.constant 4 : index
    %c0_53 = arith.constant 0 : index
    %c0_54 = arith.constant 0 : index
    %137 = vector.load %arg1[%c4, %c0_53, %c0_54] : memref<6x40x40xf32, #tpu.memory_space<vmem>>, vector<1x40x40xf32>
    %138 = vector.shape_cast %137 : vector<1x40x40xf32> to vector<40x40xf32>
    %cst_55 = arith.constant dense<0.000000e+00> : vector<16x40xf32>
    %139 = tpu.matmul %136, %138, %cst_55 {dimension_numbers = #tpu.dot_dimension_numbers<[1], [0], [0], [1], [0, 0, 1, 1], [], []>} : vector<16x40xf32>, vector<40x40xf32>, vector<16x40xf32> -> vector<16x40xf32>
    %c4_56 = arith.constant 4 : index
    %c0_57 = arith.constant 0 : index
    %140 = vector.load %arg2[%c4_56, %c0_57] : memref<13x40xf32, #tpu.memory_space<vmem>>, vector<1x40xf32>
    %c10 = arith.constant 10 : index
    %c0_58 = arith.constant 0 : index
    %141 = vector.load %arg2[%c10, %c0_58] : memref<13x40xf32, #tpu.memory_space<vmem>>, vector<1x40xf32>
    %142 = vector.extract_strided_slice %139 {offsets = [0, 0], sizes = [1, 40], strides = [1, 1]} : vector<16x40xf32> to vector<1x40xf32>
    %143 = vector.broadcast %142 : vector<1x40xf32> to vector<16x40xf32>
    %144 = arith.subf %139, %143 : vector<16x40xf32>
    %cst_59 = arith.constant dense<0.000000e+00> : vector<40xf32>
    %145 = vector.multi_reduction <add>, %144, %cst_59 [0] : vector<16x40xf32> to vector<40xf32>
    %146 = vector.shape_cast %145 : vector<40xf32> to vector<1x40xf32>
    %147 = arith.mulf %144, %144 : vector<16x40xf32>
    %cst_60 = arith.constant dense<0.000000e+00> : vector<40xf32>
    %148 = vector.multi_reduction <add>, %147, %cst_60 [0] : vector<16x40xf32> to vector<40xf32>
    %149 = vector.shape_cast %148 : vector<40xf32> to vector<1x40xf32>
    %cst_61 = arith.constant 6.250000e-02 : f32
    %150 = vector.broadcast %cst_61 : f32 to vector<1x40xf32>
    %151 = arith.mulf %146, %150 : vector<1x40xf32>
    %152 = arith.addf %142, %151 : vector<1x40xf32>
    %cst_62 = arith.constant 6.250000e-02 : f32
    %153 = vector.broadcast %cst_62 : f32 to vector<1x40xf32>
    %154 = arith.mulf %149, %153 : vector<1x40xf32>
    %155 = arith.mulf %151, %151 : vector<1x40xf32>
    %156 = arith.subf %154, %155 : vector<1x40xf32>
    %cst_63 = arith.constant 0.000000e+00 : f32
    %157 = vector.broadcast %cst_63 : f32 to vector<1x40xf32>
    %158 = arith.maximumf %156, %157 : vector<1x40xf32>
    %cst_64 = arith.constant 9.99999974E-6 : f32
    %159 = vector.broadcast %cst_64 : f32 to vector<1x40xf32>
    %160 = arith.addf %158, %159 : vector<1x40xf32>
    %161 = math.rsqrt %160 : vector<1x40xf32>
    %162 = arith.mulf %140, %161 : vector<1x40xf32>
    %163 = arith.mulf %152, %162 : vector<1x40xf32>
    %164 = arith.subf %141, %163 : vector<1x40xf32>
    %165 = vector.broadcast %162 : vector<1x40xf32> to vector<16x40xf32>
    %166 = arith.mulf %139, %165 : vector<16x40xf32>
    %167 = vector.broadcast %164 : vector<1x40xf32> to vector<16x40xf32>
    %168 = arith.addf %166, %167 : vector<16x40xf32>
    %cst_65 = arith.constant 0.000000e+00 : f32
    %169 = vector.broadcast %cst_65 : f32 to vector<16x40xf32>
    %170 = arith.maximumf %168, %169 : vector<16x40xf32>
    %c5 = arith.constant 5 : index
    %c0_66 = arith.constant 0 : index
    %c0_67 = arith.constant 0 : index
    %171 = vector.load %arg1[%c5, %c0_66, %c0_67] : memref<6x40x40xf32, #tpu.memory_space<vmem>>, vector<1x40x40xf32>
    %172 = vector.shape_cast %171 : vector<1x40x40xf32> to vector<40x40xf32>
    %cst_68 = arith.constant dense<0.000000e+00> : vector<16x40xf32>
    %173 = tpu.matmul %170, %172, %cst_68 {dimension_numbers = #tpu.dot_dimension_numbers<[1], [0], [0], [1], [0, 0, 1, 1], [], []>} : vector<16x40xf32>, vector<40x40xf32>, vector<16x40xf32> -> vector<16x40xf32>
    %c5_69 = arith.constant 5 : index
    %c0_70 = arith.constant 0 : index
    %174 = vector.load %arg2[%c5_69, %c0_70] : memref<13x40xf32, #tpu.memory_space<vmem>>, vector<1x40xf32>
    %c11 = arith.constant 11 : index
    %c0_71 = arith.constant 0 : index
    %175 = vector.load %arg2[%c11, %c0_71] : memref<13x40xf32, #tpu.memory_space<vmem>>, vector<1x40xf32>
    %176 = vector.extract_strided_slice %173 {offsets = [0, 0], sizes = [1, 40], strides = [1, 1]} : vector<16x40xf32> to vector<1x40xf32>
    %177 = vector.broadcast %176 : vector<1x40xf32> to vector<16x40xf32>
    %178 = arith.subf %173, %177 : vector<16x40xf32>
    %cst_72 = arith.constant dense<0.000000e+00> : vector<40xf32>
    %179 = vector.multi_reduction <add>, %178, %cst_72 [0] : vector<16x40xf32> to vector<40xf32>
    %180 = vector.shape_cast %179 : vector<40xf32> to vector<1x40xf32>
    %181 = arith.mulf %178, %178 : vector<16x40xf32>
    %cst_73 = arith.constant dense<0.000000e+00> : vector<40xf32>
    %182 = vector.multi_reduction <add>, %181, %cst_73 [0] : vector<16x40xf32> to vector<40xf32>
    %183 = vector.shape_cast %182 : vector<40xf32> to vector<1x40xf32>
    %cst_74 = arith.constant 6.250000e-02 : f32
    %184 = vector.broadcast %cst_74 : f32 to vector<1x40xf32>
    %185 = arith.mulf %180, %184 : vector<1x40xf32>
    %186 = arith.addf %176, %185 : vector<1x40xf32>
    %cst_75 = arith.constant 6.250000e-02 : f32
    %187 = vector.broadcast %cst_75 : f32 to vector<1x40xf32>
    %188 = arith.mulf %183, %187 : vector<1x40xf32>
    %189 = arith.mulf %185, %185 : vector<1x40xf32>
    %190 = arith.subf %188, %189 : vector<1x40xf32>
    %cst_76 = arith.constant 0.000000e+00 : f32
    %191 = vector.broadcast %cst_76 : f32 to vector<1x40xf32>
    %192 = arith.maximumf %190, %191 : vector<1x40xf32>
    %cst_77 = arith.constant 9.99999974E-6 : f32
    %193 = vector.broadcast %cst_77 : f32 to vector<1x40xf32>
    %194 = arith.addf %192, %193 : vector<1x40xf32>
    %195 = math.rsqrt %194 : vector<1x40xf32>
    %196 = arith.mulf %174, %195 : vector<1x40xf32>
    %197 = arith.mulf %186, %196 : vector<1x40xf32>
    %198 = arith.subf %175, %197 : vector<1x40xf32>
    %199 = vector.broadcast %196 : vector<1x40xf32> to vector<16x40xf32>
    %200 = arith.mulf %173, %199 : vector<16x40xf32>
    %201 = vector.broadcast %198 : vector<1x40xf32> to vector<16x40xf32>
    %202 = arith.addf %200, %201 : vector<16x40xf32>
    %cst_78 = arith.constant 0.000000e+00 : f32
    %203 = vector.broadcast %cst_78 : f32 to vector<16x40xf32>
    %204 = arith.maximumf %202, %203 : vector<16x40xf32>
    %c12 = arith.constant 12 : index
    %c0_79 = arith.constant 0 : index
    %205 = vector.load %arg2[%c12, %c0_79] : memref<13x40xf32, #tpu.memory_space<vmem>>, vector<1x40xf32>
    %206 = vector.broadcast %205 : vector<1x40xf32> to vector<16x40xf32>
    %207 = arith.mulf %204, %206 : vector<16x40xf32>
    %cst_80 = arith.constant dense<0.000000e+00> : vector<16xf32>
    %208 = vector.multi_reduction <add>, %207, %cst_80 [1] : vector<16x40xf32> to vector<16xf32>
    %209 = vector.shape_cast %208 : vector<16xf32> to vector<16x1xf32>
    %c0_81 = arith.constant 0 : index
    %c0_82 = arith.constant 0 : index
    %210 = memref.load %arg3[%c0_81, %c0_82] : memref<1x1xf32, #tpu.memory_space<smem>>
    %211 = vector.broadcast %210 : f32 to vector<16x1xf32>
    %212 = arith.addf %209, %211 : vector<16x1xf32>
    %c0_83 = arith.constant 0 : index
    %c0_84 = arith.constant 0 : index
    %213 = vector.load %arg4[%c0_83, %c0_84] : memref<16x1xf32, #tpu.memory_space<vmem>>, vector<16x1xf32>
    tpu.vector_store %arg4[%c0_83, %c0_84], %212 {strides = array<i32>} : memref<16x1xf32, #tpu.memory_space<vmem>>, vector<16x1xf32>,
    return
  }
}

</mosaic_0001>

<bundles_post_ra>
// kernel: tpu_custom_call.1
= control target key start
LH: loop header
LB: loop body
LE: loop exit
PB: predicated region body
PF: predicated region fallthrough
CT: control target
= control target key end

     0   :  { %10 = vsyncpa [#allocation4], 0  ;;  %s1239_s0 = inlined_call_operand.hbm [shape: f32[16,13], index: 0, kind: input, shape index: {}]   ;;  %s1240_s1 = inlined_call_operand.hbm [shape: f32[6,40,40], index: 1, kind: input, shape index: {}]   ;;  %s1241_s2 = inlined_call_operand.hbm [shape: f32[13,40], index: 2, kind: input, shape index: {}]   ;;  %s1242_s3 = inlined_call_operand.<no memory space> [shape: f32[1,1], index: 3, kind: input, shape index: {}]   ;;  %s1243_s4 = inlined_call_operand.vmem [shape: f32[16,1], index: 4, kind: output, shape index: {}]  }
   0x1   :  { %11 = vsyncpa [#allocation6], 0  ;;  %s1135_s15 = smov [#allocation5]   ;;  %s1136_s17 = smov [#allocation3]  }
   0x2   :  { %s29_s16 = sshll.u32 %s1135_s15, 4  ;;  %s17_s18 = sshll.u32 %s1136_s17, 4  ;;  %s30_s16 = int_to_ptr.vmem [resolvable:$true] %s29_s16  ;;  %s18_s18 = int_to_ptr.vmem [resolvable:$true] %s17_s18 }
   0x3   :  { %s1079_s19 = scalar_lea.vmem %s30_s16, 3840  ;;  %p1084_p1 = scmp.lt.s32.totalorder %s30_s16, %s30_s16 }
   0x4   :  { %p1080_p0 = scmp.ne.s32.totalorder %s30_s16, %s1079_s19  ;;  %p1085_p2 = scmp.lt.s32.totalorder %s1079_s19, %s1079_s19 }
   0x6   :  { %p1086_p3 = por %p1085_p2, %p1084_p1 }
   0x8   :  { %p1087_p4 = pnand %p1086_p3, %p1080_p0 }
   0xa   :  { %1090 = shalt.err (!%p1087_p4)
}
   0xb   :  { %s1137_s20 = smov 128   ;;  %s1138_s21 = smov 8  }
   0xc   :  { %35 = dma.hbm_to_vmem [thread:$0]  %s1240_s1, 3840, %s30_s16, [#allocation6], %s1137_s20, %s1137_s20, %s1138_s21  }
   0xd   :  { %s1099_s24 = scalar_lea.vmem %s18_s18, 256  ;;  %p1104_p6 = scmp.lt.s32.totalorder %s18_s18, %s18_s18 }
   0xe   :  { %p1100_p5 = scmp.ne.s32.totalorder %s18_s18, %s1099_s24  ;;  %p1105_p7 = scmp.lt.s32.totalorder %s1099_s24, %s1099_s24 }
  0x10   :  { %p1106_p8 = por %p1105_p7, %p1104_p6 }
  0x12   :  { %p1107_p9 = pnand %p1106_p8, %p1100_p5 }
  0x14   :  { %1110 = shalt.err (!%p1107_p9)
}
  0x15   :  { %23 = dma.hbm_to_vmem [thread:$0]  %s1239_s0, 256, %s18_s18, [#allocation4], %s1137_s20, %s1137_s20, %s1138_s21  }
  0x16   :  { %s1139_s27 = smov [#allocation7]  }
  0x17   :  { %s41_s28 = sshll.u32 %s1139_s27, 4  ;;  %s42_s28 = int_to_ptr.vmem [resolvable:$true] %s41_s28 }
  0x18   :  { %s1119_s29 = scalar_lea.vmem %s42_s28, 256  ;;  %p1124_p11 = scmp.lt.s32.totalorder %s42_s28, %s42_s28 }
  0x19   :  { %p1120_p10 = scmp.ne.s32.totalorder %s42_s28, %s1119_s29  ;;  %p1125_p12 = scmp.lt.s32.totalorder %s1119_s29, %s1119_s29 }
  0x1b   :  { %p1126_p13 = por %p1125_p12, %p1124_p11 }
  0x1d   :  { %p1127_p0 = pnand %p1126_p13, %p1120_p10 }
  0x1f   :  { %1130 = shalt.err (!%p1127_p0)
}
  0x20   :  { %47 = dma.hbm_to_vmem [thread:$0]  %s1241_s2, 256, %s42_s28, [#allocation6], %s1137_s20, %s1137_s20, %s1138_s21  }
  0x21   :  { %1131 = dma.done.wait [#allocation4], 256  }
  0x22   :  { %1132 = vsyncadd [#allocation4], 4294967040 }
  0x23   :  { %1133 = dma.done.wait [#allocation6], 4096  }
  0x24   :  { %1134 = vsyncadd [#allocation6], 4294963200  ;;  %vm70_vm0 = vcmask 1044480   ;;  %vm63_vm1 = vcmask 105472   ;;  %v62_v0 = vld [vmem:[#allocation5 + $0x8] sm:$0x1f]  ;;  %v151_v9 = vlaneseq }
  0x25   :  { %v61_v1 = vld [vmem:[#allocation5] sm:$0xff]  ;;  %v59_v2 = vld [vmem:[#allocation3] sm:$0xff]  ;;  %982 = vmatprep.subr.msk.mxu0 %vm70_vm0, %v62_v0  ;;  %v60_v3 = vld [vmem:[#allocation3 + $0x8] sm:$0xff]  ;;  %vm157_vm2 = vcmask 326656   ;;  %vm920_vm3 = vcmask 7168  }
  0x26   :  { %986 = vmatprep.mubr.msk.f32.mxu0 %vm63_vm1, %v59_v2  ;;  %983 = vmatpush3.msk.msra.mxu0 %vm70_vm0, %v62_v0  ;;  %v208_v4 = vld [vmem:[#allocation5 + $0x48] sm:$0xff]  ;;  %v207_v5 = vld [vmem:[#allocation5 + $0x40] sm:$0xff]  ;;  %v206_v6 = vld [vmem:[#allocation5 + $0x38] sm:$0xff]  ;;  %v152_v10 = vshrl.u32 %v151_v9, 7 }
  0x27   :  { %984 = vmatprep.subr.mxu0 %v61_v1  ;;  %989 = vmatprep.subr.mxu1 %v208_v4  ;;  %v205_v7 = vld [vmem:[#allocation5 + $0x30] sm:$0xff]  ;;  %v204_v8 = vld [vmem:[#allocation5 + $0x28] sm:$0xff]  ;;  %v346_v60 = vld [vmem:[#allocation5 + $0x60] sm:$0xff] }
  0x28   :  { %985 = vmatpush3.msra.mxu0 %v61_v1  ;;  %990 = vmatpush3.msra.mxu1 %v208_v4  ;;  %v1174_v11 = vsub.s32 0, %v152_v10  ;;  %v149_v43 = vld [vmem:[#allocation7] sm:$0x1]  ;;  %v150_v47 = vld [vmem:[#allocation7 + $0x6] sm:$0x1]  ;;  %v347_v59 = vld [vmem:[#allocation5 + $0x68] sm:$0xff] }
  0x29   :  { %987 = vmatmul.mubr.msk.f32.vlgmr.msra.gmra.mxu0 %vm63_vm1, %v60_v3  ;;  %991 = vmatprep.subr.mxu1 %v207_v5  ;;  %v348_v58 = vld [vmem:[#allocation5 + $0x70] sm:$0xff]  ;;  %v345_v61 = vld [vmem:[#allocation5 + $0x58] sm:$0xff] }
  0x2a   :  { %992 = vmatpush3.msra.mxu1 %v207_v5  ;;  %1002 = vmatprep.subr.mxu0 %v348_v58  ;;  %v344_v62 = vld [vmem:[#allocation5 + $0x50] sm:$0xff] }
  0x2b   :  { %993 = vmatprep.subr.mxu1 %v206_v6  ;;  %1003 = vmatpush3.msra.mxu0 %v348_v58 }
  0x2c   :  { %994 = vmatpush3.msra.mxu1 %v206_v6  ;;  %1004 = vmatprep.subr.mxu0 %v347_v59 }
  0x2d   :  { %995 = vmatprep.subr.mxu1 %v205_v7  ;;  %1005 = vmatpush3.msra.mxu0 %v347_v59 }
  0x2e   :  { %996 = vmatpush3.msra.mxu1 %v205_v7  ;;  %1006 = vmatprep.subr.mxu0 %v346_v60 }
  0x2f   :  { %997 = vmatprep.subr.mxu1 %v204_v8  ;;  %1007 = vmatpush3.msra.mxu0 %v346_v60 }
  0x30   :  { %998 = vmatpush3.msra.mxu1 %v204_v8  ;;  %1008 = vmatprep.subr.mxu0 %v345_v61 }
  0x31   :  { %1009 = vmatpush3.msra.mxu0 %v345_v61 }
  0x32   :  { %1010 = vmatprep.subr.mxu0 %v344_v62 }
  0x33   :  { %1011 = vmatpush3.msra.mxu0 %v344_v62 }
  0xe9   :  { %v988_v12 = vpop.f32.mrf.mxu0 }
  0xeb   :  { %v140_v13 = vpop.f32.mrf.mxu0 }
  0xec   :  { %v154_v14 = vrot.slane %v140_v13, %v1174_v11 }
  0xee   :  { %v155_v15 = vsub.f32 %v140_v13, %v154_v14  ;;  %v156_v16 = vsub.f32 %v988_v12, %v154_v14 }
  0xf0   :  { %v158_v17 = vsel %vm157_vm2, %v155_v15, 0.0  ;;  %v159_v18 = vsel %vm157_vm2, %v156_v16, 0.0  ;;  %v167_v19 = vmul.f32 %v155_v15, %v155_v15  ;;  %v168_v20 = vmul.f32 %v156_v16, %v156_v16 }
  0xf1   :  { %v160_v21 = vadd.f32 %v159_v18, %v158_v17 }
  0xf2   :  { %v169_v22 = vsel %vm157_vm2, %v167_v19, 0.0  ;;  %v170_v23 = vsel %vm157_vm2, %v168_v20, 0.0 }
  0xf3   :  { %v161_v24 = vrot.slane %v160_v21, 4  ;;  %v171_v25 = vadd.f32 %v170_v23, %v169_v22 }
  0xf5   :  { %v162_v26 = vadd.f32 %v161_v24, %v160_v21  ;;  %v172_v27 = vrot.slane %v171_v25, 4 }
  0xf7   :  { %v163_v28 = vrot.slane %v162_v26, 2  ;;  %v173_v29 = vadd.f32 %v172_v27, %v171_v25 }
  0xf9   :  { %v164_v30 = vadd.f32 %v163_v28, %v162_v26  ;;  %v174_v31 = vrot.slane %v173_v29, 2 }
  0xfb   :  { %v165_v32 = vrot.slane %v164_v30, 1  ;;  %v175_v33 = vadd.f32 %v174_v31, %v173_v29  ;;  %v290_v31 = vld [vmem:[#allocation7 + $0x1] sm:$0x1] }
  0xfd   :  { %v166_v34 = vadd.f32 %v165_v32, %v164_v30  ;;  %v176_v35 = vrot.slane %v175_v33, 1 }
  0xff   :  { %v177_v36 = vadd.f32 %v176_v35, %v175_v33  ;;  %v178_v37 = vmul.f32 0.0625, %v166_v34  ;;  %v291_v35 = vld [vmem:[#allocation7 + $0x7] sm:$0x1] }
 0x101   :  { %v180_v38 = vmul.f32 0.0625, %v177_v36  ;;  %v181_v39 = vmul.f32 %v178_v37, %v178_v37  ;;  %v179_v45 = vadd.f32 %v178_v37, %v140_v13 }
 0x103   :  { %v182_v40 = vsub.f32 %v180_v38, %v181_v39 }
 0x105   :  { %v183_v41 = vmax.f32 %v182_v40, 0.0 }
 0x107   :  { %v184_v42 = vadd.f32 1e-05, %v183_v41 }
 0x109   :  { %1059 = vrsqrt.f32 %v184_v42 }
 0x116   :  { %v1060_v44 = vpop.eup %1059 }
 0x117   :  { %v186_v46 = vmul.f32 %v1060_v44, %v149_v43 }
 0x119   :  { %v187_v48 = vmul.f32 %v186_v46, %v179_v45  ;;  %v192_v49 = vrot.slane %v186_v46, %v1174_v11  ;;  %v488_v46 = vld [vmem:[#allocation5 + $0x98] sm:$0xff] }
 0x11a   :  { %1015 = vmatprep.subr.mxu1 %v488_v46 }
 0x11b   :  { %v188_v50 = vsub.f32 %v150_v47, %v187_v48  ;;  %v193_v51 = vmul.f32 %v192_v49, %v140_v13  ;;  %v194_v52 = vmul.f32 %v988_v12, %v192_v49  ;;  %v487_v47 = vld [vmem:[#allocation5 + $0x90] sm:$0xff]  ;;  %v486_v48 = vld [vmem:[#allocation5 + $0x88] sm:$0xff]  ;;  %v485_v49 = vld [vmem:[#allocation5 + $0x80] sm:$0xff] }
 0x11d   :  { %v198_v53 = vrot.slane %v188_v50, %v1174_v11  ;;  %v484_v50 = vld [vmem:[#allocation5 + $0x78] sm:$0xff] }
 0x11f   :  { %v199_v54 = vadd.f32 %v198_v53, %v193_v51  ;;  %v200_v55 = vadd.f32 %v198_v53, %v194_v52 }
 0x121   :  { %v201_v56 = vmax.f32 %v199_v54, 0.0  ;;  %v202_v57 = vmax.f32 %v200_v55, 0.0 }
 0x123   :  { %999 = vmatprep.mubr.msk.f32.mxu1 %vm157_vm2, %v201_v56 }
 0x124   :  { %1000 = vmatmul.mubr.msk.f32.vlgmr.msra.gmra.mxu1 %vm157_vm2, %v202_v57 }
 0x125   :  { %1016 = vmatpush3.msra.mxu1 %v488_v46 }
 0x126   :  { %1017 = vmatprep.subr.mxu1 %v487_v47 }
 0x127   :  { %1018 = vmatpush3.msra.mxu1 %v487_v47 }
 0x128   :  { %1019 = vmatprep.subr.mxu1 %v486_v48 }
 0x129   :  { %1020 = vmatpush3.msra.mxu1 %v486_v48 }
 0x12a   :  { %1021 = vmatprep.subr.mxu1 %v485_v49 }
 0x12b   :  { %1022 = vmatpush3.msra.mxu1 %v485_v49 }
 0x12c   :  { %1023 = vmatprep.subr.mxu1 %v484_v50 }
 0x12d   :  { %1024 = vmatpush3.msra.mxu1 %v484_v50 }
 0x1e4   :  { %v1001_v63 = vpop.f32.mrf.mxu1 }
 0x1e6   :  { %v281_v0 = vpop.f32.mrf.mxu1 }
 0x1e7   :  { %v295_v1 = vrot.slane %v281_v0, %v1174_v11 }
 0x1e9   :  { %v296_v2 = vsub.f32 %v281_v0, %v295_v1  ;;  %v297_v3 = vsub.f32 %v1001_v63, %v295_v1 }
 0x1eb   :  { %v298_v4 = vsel %vm157_vm2, %v296_v2, 0.0  ;;  %v299_v5 = vsel %vm157_vm2, %v297_v3, 0.0  ;;  %v307_v6 = vmul.f32 %v296_v2, %v296_v2  ;;  %v308_v7 = vmul.f32 %v297_v3, %v297_v3 }
 0x1ec   :  { %v300_v8 = vadd.f32 %v299_v5, %v298_v4 }
 0x1ed   :  { %v309_v9 = vsel %vm157_vm2, %v307_v6, 0.0  ;;  %v310_v10 = vsel %vm157_vm2, %v308_v7, 0.0 }
 0x1ee   :  { %v301_v12 = vrot.slane %v300_v8, 4  ;;  %v311_v13 = vadd.f32 %v310_v10, %v309_v9 }
 0x1f0   :  { %v302_v14 = vadd.f32 %v301_v12, %v300_v8  ;;  %v312_v15 = vrot.slane %v311_v13, 4 }
 0x1f2   :  { %v303_v16 = vrot.slane %v302_v14, 2  ;;  %v313_v17 = vadd.f32 %v312_v15, %v311_v13 }
 0x1f4   :  { %v304_v18 = vadd.f32 %v303_v16, %v302_v14  ;;  %v314_v19 = vrot.slane %v313_v17, 2 }
 0x1f6   :  { %v305_v20 = vrot.slane %v304_v18, 1  ;;  %v315_v21 = vadd.f32 %v314_v19, %v313_v17  ;;  %v430_v19 = vld [vmem:[#allocation7 + $0x2] sm:$0x1] }
 0x1f8   :  { %v306_v22 = vadd.f32 %v305_v20, %v304_v18  ;;  %v316_v23 = vrot.slane %v315_v21, 1 }
 0x1fa   :  { %v317_v24 = vadd.f32 %v316_v23, %v315_v21  ;;  %v318_v25 = vmul.f32 0.0625, %v306_v22  ;;  %v431_v23 = vld [vmem:[#allocation7 + $0x8] sm:$0x1] }
 0x1fc   :  { %v320_v26 = vmul.f32 0.0625, %v317_v24  ;;  %v321_v27 = vmul.f32 %v318_v25, %v318_v25  ;;  %v319_v33 = vadd.f32 %v318_v25, %v281_v0 }
 0x1fe   :  { %v322_v28 = vsub.f32 %v320_v26, %v321_v27 }
 0x200   :  { %v323_v29 = vmax.f32 %v322_v28, 0.0 }
 0x202   :  { %v324_v30 = vadd.f32 1e-05, %v323_v29 }
 0x204   :  { %1061 = vrsqrt.f32 %v324_v30 }
 0x211   :  { %v1062_v32 = vpop.eup %1061 }
 0x212   :  { %v326_v34 = vmul.f32 %v1062_v32, %v290_v31 }
 0x214   :  { %v327_v36 = vmul.f32 %v326_v34, %v319_v33  ;;  %v332_v37 = vrot.slane %v326_v34, %v1174_v11  ;;  %v628_v34 = vld [vmem:[#allocation5 + $0xc0] sm:$0xff] }
 0x215   :  { %1028 = vmatprep.subr.mxu0 %v628_v34 }
 0x216   :  { %v328_v38 = vsub.f32 %v291_v35, %v327_v36  ;;  %v333_v39 = vmul.f32 %v332_v37, %v281_v0  ;;  %v334_v40 = vmul.f32 %v1001_v63, %v332_v37  ;;  %v627_v35 = vld [vmem:[#allocation5 + $0xb8] sm:$0xff]  ;;  %v626_v36 = vld [vmem:[#allocation5 + $0xb0] sm:$0xff]  ;;  %v625_v37 = vld [vmem:[#allocation5 + $0xa8] sm:$0xff] }
 0x218   :  { %v338_v41 = vrot.slane %v328_v38, %v1174_v11  ;;  %v624_v38 = vld [vmem:[#allocation5 + $0xa0] sm:$0xff] }
 0x21a   :  { %v339_v42 = vadd.f32 %v338_v41, %v333_v39  ;;  %v340_v43 = vadd.f32 %v338_v41, %v334_v40 }
 0x21c   :  { %v341_v44 = vmax.f32 %v339_v42, 0.0  ;;  %v342_v45 = vmax.f32 %v340_v43, 0.0 }
 0x21e   :  { %1012 = vmatprep.mubr.msk.f32.mxu0 %vm157_vm2, %v341_v44 }
 0x21f   :  { %1013 = vmatmul.mubr.msk.f32.vlgmr.msra.gmra.mxu0 %vm157_vm2, %v342_v45 }
 0x220   :  { %1029 = vmatpush3.msra.mxu0 %v628_v34 }
 0x221   :  { %1030 = vmatprep.subr.mxu0 %v627_v35 }
 0x222   :  { %1031 = vmatpush3.msra.mxu0 %v627_v35 }
 0x223   :  { %1032 = vmatprep.subr.mxu0 %v626_v36 }
 0x224   :  { %1033 = vmatpush3.msra.mxu0 %v626_v36 }
 0x225   :  { %1034 = vmatprep.subr.mxu0 %v625_v37 }
 0x226   :  { %1035 = vmatpush3.msra.mxu0 %v625_v37 }
 0x227   :  { %1036 = vmatprep.subr.mxu0 %v624_v38 }
 0x228   :  { %1037 = vmatpush3.msra.mxu0 %v624_v38 }
 0x2df   :  { %v1014_v51 = vpop.f32.mrf.mxu0 }
 0x2e1   :  { %v421_v52 = vpop.f32.mrf.mxu0 }
 0x2e2   :  { %v435_v53 = vrot.slane %v421_v52, %v1174_v11 }
 0x2e4   :  { %v436_v54 = vsub.f32 %v421_v52, %v435_v53  ;;  %v437_v55 = vsub.f32 %v1014_v51, %v435_v53 }
 0x2e6   :  { %v438_v56 = vsel %vm157_vm2, %v436_v54, 0.0  ;;  %v439_v57 = vsel %vm157_vm2, %v437_v55, 0.0  ;;  %v447_v58 = vmul.f32 %v436_v54, %v436_v54  ;;  %v448_v59 = vmul.f32 %v437_v55, %v437_v55 }
 0x2e7   :  { %v440_v60 = vadd.f32 %v439_v57, %v438_v56 }
 0x2e8   :  { %v449_v61 = vsel %vm157_vm2, %v447_v58, 0.0  ;;  %v450_v62 = vsel %vm157_vm2, %v448_v59, 0.0 }
 0x2e9   :  { %v441_v63 = vrot.slane %v440_v60, 4  ;;  %v451_v0 = vadd.f32 %v450_v62, %v449_v61 }
 0x2eb   :  { %v442_v1 = vadd.f32 %v441_v63, %v440_v60  ;;  %v452_v2 = vrot.slane %v451_v0, 4 }
 0x2ed   :  { %v443_v3 = vrot.slane %v442_v1, 2  ;;  %v453_v4 = vadd.f32 %v452_v2, %v451_v0 }
 0x2ef   :  { %v444_v5 = vadd.f32 %v443_v3, %v442_v1  ;;  %v454_v6 = vrot.slane %v453_v4, 2 }
 0x2f1   :  { %v445_v7 = vrot.slane %v444_v5, 1  ;;  %v455_v8 = vadd.f32 %v454_v6, %v453_v4  ;;  %v570_v6 = vld [vmem:[#allocation7 + $0x3] sm:$0x1] }
 0x2f3   :  { %v446_v9 = vadd.f32 %v445_v7, %v444_v5  ;;  %v456_v10 = vrot.slane %v455_v8, 1 }
 0x2f5   :  { %v457_v12 = vadd.f32 %v456_v10, %v455_v8  ;;  %v458_v13 = vmul.f32 0.0625, %v446_v9  ;;  %v571_v10 = vld [vmem:[#allocation7 + $0x9] sm:$0x1] }
 0x2f7   :  { %v460_v14 = vmul.f32 0.0625, %v457_v12  ;;  %v461_v15 = vmul.f32 %v458_v13, %v458_v13  ;;  %v459_v21 = vadd.f32 %v458_v13, %v421_v52 }
 0x2f9   :  { %v462_v16 = vsub.f32 %v460_v14, %v461_v15 }
 0x2fb   :  { %v463_v17 = vmax.f32 %v462_v16, 0.0 }
 0x2fd   :  { %v464_v18 = vadd.f32 1e-05, %v463_v17 }
 0x2ff   :  { %1063 = vrsqrt.f32 %v464_v18 }
 0x30c   :  { %v1064_v20 = vpop.eup %1063 }
 0x30d   :  { %v466_v22 = vmul.f32 %v1064_v20, %v430_v19 }
 0x30f   :  { %v467_v24 = vmul.f32 %v466_v22, %v459_v21  ;;  %v472_v25 = vrot.slane %v466_v22, %v1174_v11  ;;  %v768_v22 = vld [vmem:[#allocation5 + $0xe8] sm:$0xff] }
 0x310   :  { %1041 = vmatprep.subr.mxu1 %v768_v22 }
 0x311   :  { %v468_v26 = vsub.f32 %v431_v23, %v467_v24  ;;  %v473_v27 = vmul.f32 %v472_v25, %v421_v52  ;;  %v474_v28 = vmul.f32 %v1014_v51, %v472_v25  ;;  %v767_v23 = vld [vmem:[#allocation5 + $0xe0] sm:$0xff]  ;;  %v766_v24 = vld [vmem:[#allocation5 + $0xd8] sm:$0xff]  ;;  %v765_v25 = vld [vmem:[#allocation5 + $0xd0] sm:$0xff] }
 0x313   :  { %v478_v29 = vrot.slane %v468_v26, %v1174_v11  ;;  %v764_v26 = vld [vmem:[#allocation5 + $0xc8] sm:$0xff] }
 0x315   :  { %v479_v30 = vadd.f32 %v478_v29, %v473_v27  ;;  %v480_v31 = vadd.f32 %v478_v29, %v474_v28 }
 0x317   :  { %v481_v32 = vmax.f32 %v479_v30, 0.0  ;;  %v482_v33 = vmax.f32 %v480_v31, 0.0 }
 0x319   :  { %1025 = vmatprep.mubr.msk.f32.mxu1 %vm157_vm2, %v481_v32 }
 0x31a   :  { %1026 = vmatmul.mubr.msk.f32.vlgmr.msra.gmra.mxu1 %vm157_vm2, %v482_v33 }
 0x31b   :  { %1042 = vmatpush3.msra.mxu1 %v768_v22 }
 0x31c   :  { %1043 = vmatprep.subr.mxu1 %v767_v23 }
 0x31d   :  { %1044 = vmatpush3.msra.mxu1 %v767_v23 }
 0x31e   :  { %1045 = vmatprep.subr.mxu1 %v766_v24 }
 0x31f   :  { %1046 = vmatpush3.msra.mxu1 %v766_v24 }
 0x320   :  { %1047 = vmatprep.subr.mxu1 %v765_v25 }
 0x321   :  { %1048 = vmatpush3.msra.mxu1 %v765_v25 }
 0x322   :  { %1049 = vmatprep.subr.mxu1 %v764_v26 }
 0x323   :  { %1050 = vmatpush3.msra.mxu1 %v764_v26 }
 0x3da   :  { %v1027_v39 = vpop.f32.mrf.mxu1 }
 0x3dc   :  { %v561_v40 = vpop.f32.mrf.mxu1 }
 0x3dd   :  { %v575_v41 = vrot.slane %v561_v40, %v1174_v11 }
 0x3df   :  { %v576_v42 = vsub.f32 %v561_v40, %v575_v41  ;;  %v577_v43 = vsub.f32 %v1027_v39, %v575_v41 }
 0x3e1   :  { %v578_v44 = vsel %vm157_vm2, %v576_v42, 0.0  ;;  %v579_v45 = vsel %vm157_vm2, %v577_v43, 0.0  ;;  %v587_v46 = vmul.f32 %v576_v42, %v576_v42  ;;  %v588_v47 = vmul.f32 %v577_v43, %v577_v43 }
 0x3e2   :  { %v580_v48 = vadd.f32 %v579_v45, %v578_v44 }
 0x3e3   :  { %v589_v49 = vsel %vm157_vm2, %v587_v46, 0.0  ;;  %v590_v50 = vsel %vm157_vm2, %v588_v47, 0.0 }
 0x3e4   :  { %v581_v51 = vrot.slane %v580_v48, 4  ;;  %v591_v52 = vadd.f32 %v590_v50, %v589_v49 }
 0x3e6   :  { %v582_v53 = vadd.f32 %v581_v51, %v580_v48  ;;  %v592_v54 = vrot.slane %v591_v52, 4 }
 0x3e8   :  { %v583_v55 = vrot.slane %v582_v53, 2  ;;  %v593_v56 = vadd.f32 %v592_v54, %v591_v52 }
 0x3ea   :  { %v584_v57 = vadd.f32 %v583_v55, %v582_v53  ;;  %v594_v58 = vrot.slane %v593_v56, 2 }
 0x3ec   :  { %v585_v59 = vrot.slane %v584_v57, 1  ;;  %v595_v60 = vadd.f32 %v594_v58, %v593_v56  ;;  %v710_v58 = vld [vmem:[#allocation7 + $0x4] sm:$0x1] }
 0x3ee   :  { %v586_v61 = vadd.f32 %v585_v59, %v584_v57  ;;  %v596_v62 = vrot.slane %v595_v60, 1 }
 0x3f0   :  { %v597_v63 = vadd.f32 %v596_v62, %v595_v60  ;;  %v598_v0 = vmul.f32 0.0625, %v586_v61  ;;  %v711_v62 = vld [vmem:[#allocation7 + $0xa] sm:$0x1] }
 0x3f2   :  { %v600_v1 = vmul.f32 0.0625, %v597_v63  ;;  %v601_v2 = vmul.f32 %v598_v0, %v598_v0  ;;  %v599_v8 = vadd.f32 %v598_v0, %v561_v40 }
 0x3f4   :  { %v602_v3 = vsub.f32 %v600_v1, %v601_v2 }
 0x3f6   :  { %v603_v4 = vmax.f32 %v602_v3, 0.0 }
 0x3f8   :  { %v604_v5 = vadd.f32 1e-05, %v603_v4 }
 0x3fa   :  { %1065 = vrsqrt.f32 %v604_v5 }
 0x407   :  { %v1066_v7 = vpop.eup %1065 }
 0x408   :  { %v606_v9 = vmul.f32 %v1066_v7, %v570_v6 }
 0x40a   :  { %v607_v12 = vmul.f32 %v606_v9, %v599_v8  ;;  %v612_v13 = vrot.slane %v606_v9, %v1174_v11 }
 0x40c   :  { %v608_v14 = vsub.f32 %v571_v10, %v607_v12  ;;  %v613_v15 = vmul.f32 %v612_v13, %v561_v40  ;;  %v614_v16 = vmul.f32 %v1027_v39, %v612_v13 }
 0x40e   :  { %v618_v17 = vrot.slane %v608_v14, %v1174_v11 }
 0x410   :  { %v619_v18 = vadd.f32 %v618_v17, %v613_v15  ;;  %v620_v19 = vadd.f32 %v618_v17, %v614_v16 }
 0x412   :  { %v621_v20 = vmax.f32 %v619_v18, 0.0  ;;  %v622_v21 = vmax.f32 %v620_v19, 0.0 }
 0x414   :  { %1038 = vmatprep.mubr.msk.f32.mxu0 %vm157_vm2, %v621_v20 }
 0x415   :  { %1039 = vmatmul.mubr.msk.f32.vlgmr.msra.gmra.mxu0 %vm157_vm2, %v622_v21 }
 0x4d5   :  { %v1040_v27 = vpop.f32.mrf.mxu0 }
 0x4d7   :  { %v701_v28 = vpop.f32.mrf.mxu0 }
 0x4d8   :  { %v715_v29 = vrot.slane %v701_v28, %v1174_v11 }
 0x4da   :  { %v716_v30 = vsub.f32 %v701_v28, %v715_v29  ;;  %v717_v31 = vsub.f32 %v1040_v27, %v715_v29 }
 0x4dc   :  { %v718_v32 = vsel %vm157_vm2, %v716_v30, 0.0  ;;  %v719_v33 = vsel %vm157_vm2, %v717_v31, 0.0  ;;  %v727_v34 = vmul.f32 %v716_v30, %v716_v30  ;;  %v728_v35 = vmul.f32 %v717_v31, %v717_v31 }
 0x4dd   :  { %v720_v36 = vadd.f32 %v719_v33, %v718_v32 }
 0x4de   :  { %v729_v37 = vsel %vm157_vm2, %v727_v34, 0.0  ;;  %v730_v38 = vsel %vm157_vm2, %v728_v35, 0.0 }
 0x4df   :  { %v721_v39 = vrot.slane %v720_v36, 4  ;;  %v731_v40 = vadd.f32 %v730_v38, %v729_v37 }
 0x4e1   :  { %v722_v41 = vadd.f32 %v721_v39, %v720_v36  ;;  %v732_v42 = vrot.slane %v731_v40, 4 }
 0x4e3   :  { %v723_v43 = vrot.slane %v722_v41, 2  ;;  %v733_v44 = vadd.f32 %v732_v42, %v731_v40 }
 0x4e5   :  { %v724_v45 = vadd.f32 %v723_v43, %v722_v41  ;;  %v734_v46 = vrot.slane %v733_v44, 2  ;;  %v850_v41 = vld [vmem:[#allocation7 + $0x5] sm:$0x1] }
 0x4e7   :  { %v725_v47 = vrot.slane %v724_v45, 1  ;;  %v735_v48 = vadd.f32 %v734_v46, %v733_v44 }
 0x4e9   :  { %v726_v49 = vadd.f32 %v725_v47, %v724_v45  ;;  %v736_v50 = vrot.slane %v735_v48, 1  ;;  %v851_v45 = vld [vmem:[#allocation7 + $0xb] sm:$0x1] }
 0x4eb   :  { %v737_v51 = vadd.f32 %v736_v50, %v735_v48  ;;  %v738_v52 = vmul.f32 0.0625, %v726_v49 }
 0x4ed   :  { %v740_v53 = vmul.f32 0.0625, %v737_v51  ;;  %v741_v54 = vmul.f32 %v738_v52, %v738_v52  ;;  %v739_v60 = vadd.f32 %v738_v52, %v701_v28 }
 0x4ef   :  { %v742_v55 = vsub.f32 %v740_v53, %v741_v54  ;;  %v942_v54 = vld [vmem:[#allocation7 + $0xc] ss:$0 sm:$0xff] }
 0x4f1   :  { %v743_v56 = vmax.f32 %v742_v55, 0.0 }
 0x4f3   :  { %v744_v57 = vadd.f32 1e-05, %v743_v56 }
 0x4f5   :  { %1067 = vrsqrt.f32 %v744_v57 }
 0x502   :  { %v1068_v59 = vpop.eup %1067 }
 0x503   :  { %v746_v61 = vmul.f32 %v1068_v59, %v710_v58 }
 0x505   :  { %v747_v63 = vmul.f32 %v746_v61, %v739_v60  ;;  %v752_v0 = vrot.slane %v746_v61, %v1174_v11  ;;  %v917_v61 = vstv %s1242_s3 }
 0x507   :  { %v748_v1 = vsub.f32 %v711_v62, %v747_v63  ;;  %v753_v2 = vmul.f32 %v752_v0, %v701_v28  ;;  %v754_v3 = vmul.f32 %v1040_v27, %v752_v0 }
 0x509   :  { %v758_v4 = vrot.slane %v748_v1, %v1174_v11 }
 0x50b   :  { %v759_v5 = vadd.f32 %v758_v4, %v753_v2  ;;  %v760_v6 = vadd.f32 %v758_v4, %v754_v3 }
 0x50d   :  { %v761_v7 = vmax.f32 %v759_v5, 0.0  ;;  %v762_v8 = vmax.f32 %v760_v6, 0.0 }
 0x50f   :  { %1051 = vmatprep.mubr.msk.f32.mxu1 %vm157_vm2, %v761_v7 }
 0x510   :  { %1052 = vmatmul.mubr.msk.f32.vlgmr.msra.gmra.mxu1 %vm157_vm2, %v762_v8 }
 0x5d0   :  { %v1053_v9 = vpop.f32.mrf.mxu1 }
 0x5d2   :  { %v841_v10 = vpop.f32.mrf.mxu1 }
 0x5d3   :  { %v855_v12 = vrot.slane %v841_v10, %v1174_v11 }
 0x5d5   :  { %v856_v13 = vsub.f32 %v841_v10, %v855_v12  ;;  %v857_v14 = vsub.f32 %v1053_v9, %v855_v12 }
 0x5d7   :  { %v858_v15 = vsel %vm157_vm2, %v856_v13, 0.0  ;;  %v859_v16 = vsel %vm157_vm2, %v857_v14, 0.0  ;;  %v867_v17 = vmul.f32 %v856_v13, %v856_v13  ;;  %v868_v18 = vmul.f32 %v857_v14, %v857_v14 }
 0x5d8   :  { %v860_v19 = vadd.f32 %v859_v16, %v858_v15 }
 0x5d9   :  { %v869_v20 = vsel %vm157_vm2, %v867_v17, 0.0  ;;  %v870_v21 = vsel %vm157_vm2, %v868_v18, 0.0 }
 0x5da   :  { %v861_v22 = vrot.slane %v860_v19, 4  ;;  %v871_v23 = vadd.f32 %v870_v21, %v869_v20 }
 0x5dc   :  { %v862_v24 = vadd.f32 %v861_v22, %v860_v19  ;;  %v872_v25 = vrot.slane %v871_v23, 4 }
 0x5de   :  { %v863_v26 = vrot.slane %v862_v24, 2  ;;  %v873_v27 = vadd.f32 %v872_v25, %v871_v23 }
 0x5e0   :  { %v864_v28 = vadd.f32 %v863_v26, %v862_v24  ;;  %v874_v29 = vrot.slane %v873_v27, 2 }
 0x5e2   :  { %v865_v30 = vrot.slane %v864_v28, 1  ;;  %v875_v31 = vadd.f32 %v874_v29, %v873_v27 }
 0x5e4   :  { %v866_v32 = vadd.f32 %v865_v30, %v864_v28  ;;  %v876_v33 = vrot.slane %v875_v31, 1 }
 0x5e6   :  { %v877_v34 = vadd.f32 %v876_v33, %v875_v31  ;;  %v878_v35 = vmul.f32 0.0625, %v866_v32 }
 0x5e8   :  { %v880_v36 = vmul.f32 0.0625, %v877_v34  ;;  %v881_v37 = vmul.f32 %v878_v35, %v878_v35  ;;  %v879_v43 = vadd.f32 %v878_v35, %v841_v10 }
 0x5ea   :  { %v882_v38 = vsub.f32 %v880_v36, %v881_v37 }
 0x5ec   :  { %v883_v39 = vmax.f32 %v882_v38, 0.0 }
 0x5ee   :  { %v884_v40 = vadd.f32 1e-05, %v883_v39 }
 0x5f0   :  { %1069 = vrsqrt.f32 %v884_v40 }
 0x5fd   :  { %v1070_v42 = vpop.eup %1069 }
 0x5fe   :  { %v886_v44 = vmul.f32 %v1070_v42, %v850_v41 }
 0x600   :  { %v887_v46 = vmul.f32 %v886_v44, %v879_v43  ;;  %v892_v47 = vrot.slane %v886_v44, %v1174_v11 }
 0x602   :  { %v888_v48 = vsub.f32 %v851_v45, %v887_v46  ;;  %v893_v49 = vmul.f32 %v892_v47, %v841_v10  ;;  %v894_v51 = vmul.f32 %v1053_v9, %v892_v47 }
 0x604   :  { %v898_v50 = vrot.slane %v888_v48, %v1174_v11 }
 0x606   :  { %v899_v52 = vadd.f32 %v898_v50, %v893_v49  ;;  %v900_v53 = vadd.f32 %v898_v50, %v894_v51 }
 0x608   :  { %v901_v55 = vmax.f32 %v899_v52, 0.0  ;;  %v902_v56 = vmax.f32 %v900_v53, 0.0 }
 0x60a   :  { %v908_v57 = vmul.f32 %v942_v54, %v901_v55  ;;  %v909_v59 = vmul.f32 %v942_v54, %v902_v56 }
 0x60c   :  { %v910_v58 = vsel %vm157_vm2, %v908_v57, 0.0  ;;  %v913_v60 = vsel %vm157_vm2, %v909_v59, 0.0 }
 0x60d   :  { %911 = vadd.xlane.f32.xlu0 %v910_v58 }
 0x611   :  { %914 = vadd.xlane.f32.xlu0 %v913_v60 }
 0x696   :  { %v912_v11 = vpop.xlane.xlu0 %911 }
 0x697   :  { %v918_v62 = vadd.f32 %v917_v61, %v912_v11 }
 0x699   :  { %921 = vst.msk [vmem:[%s1243_s4] sm:$0xff] %vm920_vm3, %v918_v62 }
 0x69a   :  { %v915_v63 = vpop.xlane.xlu0 %914 }
 0x69b   :  { %v919_v0 = vadd.f32 %v917_v61, %v915_v63 }
 0x69d   :  { %922 = vst.msk [vmem:[%s1243_s4 + $0x8] sm:$0xff] %vm920_vm3, %v919_v0 }
 0x69e   :  { %927 = vsyncpa [#allocation4], 1 }
 0x69f   :  { %928 = vsyncpa [#allocation6], 1 }

</bundles_post_ra>
